<compile_context>
chip_gen: v6e
topology: v6e:2x2x1
jax: 0.10.0
libtpu: 0.0.40
codegen_flags: <defaults>
</compile_context>

<pallas_src>
import functools

import jax
import jax.numpy as jnp
import numpy as np
from jax import lax
from jax.experimental import pallas as pl
from jax.experimental.pallas import tpu as pltpu

AGGREGATION_METHODS = ("sum", "mean", "max", "min")

_TILE_VMEM_BUDGET = 32 * 1024 * 1024   # double-buffered working-set target
_VMEM_LIMIT_BYTES = 48 * 1024 * 1024   # safe on v5e/v6e (128 MiB) and v7x (64 MiB)


# ------------------------------- helpers ----------------------------------- #

def _round_up(a: int, b: int) -> int:
    return ((a + b - 1) // b) * b


def _select_tiles(n_pad, f_pad, adj_bytes, x_bytes, out_bytes,
                  budget=_TILE_VMEM_BUDGET):
    """Pick (tm, tk, tn).  Prefer tn == f_pad (adj streamed exactly once), then
    the largest tk, subject to a double-buffered VMEM working-set budget."""
    tm = 256 if n_pad % 256 == 0 else 128
    tn_cands = sorted({t for t in (f_pad, 2048, 1024, 512, 256, 128)
                       if t <= f_pad and f_pad % t == 0}, reverse=True)
    tk_cands = sorted({t for t in (2048, 1024, 512, 256, 128)
                       if t <= n_pad and n_pad % t == 0}, reverse=True)
    for tn in tn_cands:
        for tk in tk_cands:
            footprint = (2 * tm * tk * adj_bytes      # adj (+ mask), dbl-buffered
                         + 2 * tk * tn * x_bytes      # x tile, dbl-buffered
                         + 2 * tm * tn * out_bytes    # resident output tile
                         + tm * tn * 4)               # f32 accumulator scratch
            if footprint <= budget:
                return tm, tk, tn
    return tm, 128, 128


# ------------------------------- kernels ----------------------------------- #

def _mp_matmul_kernel_accout(flags_ref, adj_ref, x_ref, out_ref):
    """sum / mean with f32 output: accumulate directly into the resident out tile."""
    i = pl.program_id(0)
    k = pl.program_id(2)

    @pl.when(k == 0)
    def _():
        out_ref[...] = jnp.zeros_like(out_ref)

    @pl.when(flags_ref[i, k] != 0)            # skip all-zero adjacency tiles
    def _():
        out_ref[...] += jnp.dot(adj_ref[...], x_ref[...],
                                preferred_element_type=jnp.float32)


def _mp_matmul_kernel_scratch(flags_ref, adj_ref, x_ref, out_ref, acc_ref):
    """sum / mean with non-f32 output: f32 scratch accumulator, cast at the end."""
    i = pl.program_id(0)
    k = pl.program_id(2)

    @pl.when(k == 0)
    def _():
        acc_ref[...] = jnp.zeros_like(acc_ref)

    @pl.when(flags_ref[i, k] != 0)
    def _():
        acc_ref[...] += jnp.dot(adj_ref[...], x_ref[...],
                                preferred_element_type=jnp.float32)

    @pl.when(k == pl.num_programs(2) - 1)
    def _():
        out_ref[...] = acc_ref[...].astype(out_ref.dtype)


def _mp_extreme_kernel(flags_ref, adj_ref, mask_ref, x_ref, out_ref, acc_ref,
                       *, is_max: bool):
    """max / min aggregation: blocked, streamed masked running extreme."""
    i = pl.program_id(0)
    k = pl.program_id(2)
    init_val = jnp.float32(-jnp.inf) if is_max else jnp.float32(jnp.inf)
    combine = jnp.maximum if is_max else jnp.minimum

    @pl.when(k == 0)
    def _():
        acc_ref[...] = jnp.full_like(acc_ref, init_val)

    @pl.when(flags_ref[i, k] != 0)            # skip tiles with no edges at all
    def _():
        tk = adj_ref.shape[1]
        blk = 8                               # 8 source columns per VMEM load

        def body(b, carry):
            jb = pl.multiple_of(b * blk, blk)
            wblk = adj_ref[:, pl.ds(jb, blk)].astype(jnp.float32)   # (tm, 8)
            mblk = mask_ref[:, pl.ds(jb, blk)]                      # (tm, 8) bf16
            xblk = x_ref[pl.ds(jb, blk), :].astype(jnp.float32)     # (8, tn)
            acc = acc_ref[...]
            for s in range(blk):
                # single select folds the edge-exists mask into the message
                msg = jnp.where(mblk[:, s:s + 1] > 0,
                                wblk[:, s:s + 1] * xblk[s:s + 1, :],
                                init_val)                            # (tm, tn)
                acc = combine(acc, msg)
            acc_ref[...] = acc                # one VMEM store per 8 sources
            return carry

        lax.fori_loop(0, tk // blk, body, 0)

    @pl.when(k == pl.num_programs(2) - 1)
    def _():
        acc = acc_ref[...]
        # rows that never saw an edge are still at the +/-inf identity
        # (assumes finite inputs; see correctness notes).
        has_edge = (acc > init_val) if is_max else (acc < init_val)
        out_ref[...] = jnp.where(has_edge, acc, 0.0).astype(out_ref.dtype)


# ------------------------------- wrapper ------------------------------------ #

def message_passing_forward(x, edge_index, edge_weights=None, *,
                            aggr="sum", compute_dtype=None):
    """Pallas-backed forward pass of MessagePassing(aggr).

    x:             [num_nodes, num_features] float
    edge_index:    [2, num_edges] int, row 0 = source, row 1 = destination
    edge_weights:  optional [num_edges] float
    compute_dtype: dtype fed to the MXU/VPU streams (default bfloat16;
                   accumulation is always f32).
    """
    if aggr not in AGGREGATION_METHODS:
        raise ValueError(
            f"Unsupported aggregation mode: {aggr}. "
            f"Use one of: {', '.join(AGGREGATION_METHODS)}"
        )

    x = jnp.asarray(x)
    num_nodes, num_feat = x.shape
    edge_index = jnp.asarray(edge_index)
    num_edges = edge_index.shape[1]
    src = edge_index[0].astype(jnp.int32)
    dst = edge_index[1].astype(jnp.int32)
    if edge_weights is None:
        w = jnp.ones((num_edges,), jnp.float32)
    else:
        w = jnp.asarray(edge_weights).astype(jnp.float32)
    if compute_dtype is None:
        compute_dtype = jnp.bfloat16   # halve the dominant O(N^2) HBM stream

    # Pad to lane/sublane-friendly grains: 256 node grain so tiles never fall
    # back to 128x128, lane-dense (>=128) feature dim for unmasked stores.
    n_pad = _round_up(max(num_nodes, 1), 256)
    f_pad = _round_up(max(num_feat, 1), 128)

    cbytes = np.dtype(compute_dtype).itemsize
    obytes = np.dtype(x.dtype).itemsize
    adj_stream_bytes = cbytes + (2 if aggr in ("max", "min") else 0)  # + bf16 mask
    tm, tk, tn = _select_tiles(n_pad, f_pad, adj_stream_bytes, cbytes, obytes)

    grid = (n_pad // tm, f_pad // tn, n_pad // tk)

    x_p = jnp.zeros((n_pad, f_pad), compute_dtype)
    x_p = x_p.at[:num_nodes, :num_feat].set(x.astype(compute_dtype))

    # Per-(dst-tile, src-tile) occupancy flags (O(E)); scalar-prefetched to SMEM
    # so empty tiles skip the matmul / masked-extreme loop entirely.
    flags = jnp.zeros((n_pad // tm, n_pad // tk), jnp.int32)
    flags = flags.at[dst // tm, src // tk].set(1)

    out_shape = jax.ShapeDtypeStruct((n_pad, f_pad), x.dtype)
    cparams = pltpu.CompilerParams(
        dimension_semantics=("parallel", "parallel", "arbitrary"),
        vmem_limit_bytes=_VMEM_LIMIT_BYTES,
    )

    if aggr in ("sum", "mean"):
        if aggr == "mean":
            # Fold 1/deg into the per-edge weights (O(E)); no lane-width-1
            # degree operand and no per-element divide in the kernel.
            deg = jnp.zeros((num_nodes,), jnp.float32).at[dst].add(1.0)
            w = w / jnp.maximum(deg[dst], 1.0)
        adj = jnp.zeros((n_pad, n_pad), jnp.float32).at[dst, src].add(w)
        adj = adj.astype(compute_dtype)

        if x.dtype == jnp.float32:
            kernel = _mp_matmul_kernel_accout
            scratch = []                       # accumulate directly into out_ref
        else:
            kernel = _mp_matmul_kernel_scratch
            scratch = [pltpu.VMEM((tm, tn), jnp.float32)]

        out_p = pl.pallas_call(
            kernel,
            out_shape=out_shape,
            grid_spec=pltpu.PrefetchScalarGridSpec(
                num_scalar_prefetch=1,
                grid=grid,
                in_specs=[
                    pl.BlockSpec((tm, tk), lambda i, j, k, fl: (i, k)),
                    pl.BlockSpec((tk, tn), lambda i, j, k, fl: (k, j)),
                ],
                out_specs=pl.BlockSpec((tm, tn), lambda i, j, k, fl: (i, j)),
                scratch_shapes=scratch,
            ),
            compiler_params=cparams,
        )(flags, adj, x_p)
    else:
        adj = jnp.zeros((n_pad, n_pad), jnp.float32).at[dst, src].add(w)
        adj = adj.astype(compute_dtype)
        # Explicit bf16 mask (exact for 0/1) so zero-weight edges stay edges.
        mask = jnp.zeros((n_pad, n_pad), jnp.bfloat16).at[dst, src].set(1.0)

        kernel = functools.partial(_mp_extreme_kernel, is_max=(aggr == "max"))
        out_p = pl.pallas_call(
            kernel,
            out_shape=out_shape,
            grid_spec=pltpu.PrefetchScalarGridSpec(
                num_scalar_prefetch=1,
                grid=grid,
                in_specs=[
                    pl.BlockSpec((tm, tk), lambda i, j, k, fl: (i, k)),  # adj
                    pl.BlockSpec((tm, tk), lambda i, j, k, fl: (i, k)),  # mask
                    pl.BlockSpec((tk, tn), lambda i, j, k, fl: (k, j)),  # x
                ],
                out_specs=pl.BlockSpec((tm, tn), lambda i, j, k, fl: (i, j)),
                scratch_shapes=[pltpu.VMEM((tm, tn), jnp.float32)],
            ),
            compiler_params=cparams,
        )(flags, adj, mask, x_p)

    return out_p[:num_nodes, :num_feat]


# ----------------------------- pure reference -------------------------------- #

def _reference_forward(x, edge_index, edge_weights, aggr):
    x = np.asarray(x)
    ei = np.asarray(edge_index)
    w = np.asarray(edge_weights)
    n, _ = x.shape
    out = np.zeros_like(x)
    for i in range(n):
        msgs = [w[e] * x[ei[0, e]] for e in range(ei.shape[1]) if ei[1, e] == i]
        if not msgs:
            continue
        m = np.stack(msgs)
        if aggr == "sum":
            out[i] = m.sum(0)
        elif aggr == "mean":
            out[i] = m.mean(0)
        elif aggr == "max":
            out[i] = m.max(0)
        else:
            out[i] = m.min(0)
    return jnp.asarray(out)


# --------------------------------- main -------------------------------------- #

if __name__ == "__main__":
    key = jax.random.PRNGKey(0)
    num_nodes, num_feat = 8, 32
    kx, kw = jax.random.split(key)

    x = jax.random.normal(kx, (num_nodes, num_feat), jnp.float32)
    # edges: columns are (src, dst). Node 7 has no in-edges -> output row 7 is 0.
    edge_index = jnp.array(
        [[0, 1, 2, 3, 4, 5, 6, 0, 2, 5],
         [1, 2, 3, 4, 5, 6, 0, 3, 0, 1]],
        dtype=jnp.int32,
    )
    edge_weights = jax.random.uniform(kw, (edge_index.shape[1],), jnp.float32) + 0.5

    for aggr in AGGREGATION_METHODS:
        ref = _reference_forward(x, edge_index, edge_weights, aggr)

        # f32 compute path: bit-tight against the reference.
        out = message_passing_forward(x, edge_index, edge_weights, aggr=aggr,
                                      compute_dtype=jnp.float32)
        out = jax.block_until_ready(out)
        assert out.shape == (num_nodes, num_feat) and out.dtype == x.dtype
        assert jnp.allclose(out, ref, atol=1e-5, rtol=1e-5), f"mismatch aggr={aggr} (f32)"

        # default bf16 compute path (halved adjacency HBM stream): loose tolerance.
        out_bf = jax.block_until_ready(
            message_passing_forward(x, edge_index, edge_weights, aggr=aggr))
        assert out_bf.shape == (num_nodes, num_feat) and out_bf.dtype == x.dtype
        assert jnp.allclose(out_bf, ref, atol=2e-1, rtol=5e-2), \
            f"mismatch aggr={aggr} (bf16 compute)"

    # default edge weights (None -> ones) + bf16 node features:
    # exercises the scratch-accumulator matmul kernel (non-f32 output).
    out = jax.block_until_ready(
        message_passing_forward(x.astype(jnp.bfloat16), edge_index, None, aggr="sum"))
    ref = _reference_forward(x, edge_index, jnp.ones((edge_index.shape[1],)), "sum")
    assert out.dtype == jnp.bfloat16
    assert jnp.allclose(out.astype(jnp.float32), ref, atol=2e-1, rtol=5e-2), \
        "mismatch for default weights / bf16 features"

    print("KERNEL_OK")
</pallas_src>

<mosaic_0001>
module attributes {stable_mosaic.version = 11 : i64} {
  func.func @_mp_matmul_kernel_accout(%arg0: i32, %arg1: i32, %arg2: i32, %arg3: memref<1x1xi32, #tpu.memory_space<smem>>, %arg4: memref<256x256xf32, #tpu.memory_space<vmem>>, %arg5: memref<256x128xf32, #tpu.memory_space<vmem>>, %arg6: memref<256x128xf32, #tpu.memory_space<vmem>>) attributes {dimension_semantics = [#tpu.dimension_semantics<parallel>, #tpu.dimension_semantics<parallel>, #tpu.dimension_semantics<arbitrary>], iteration_bounds = array<i64: 1, 1, 1>, scalar_prefetch = 1 : i64, scratch_operands = 0 : i64, tpu.core_type = #tpu.core_type<tc>, window_params = [{transform_indices = @transform_0, window_bounds = array<i64: 256, 256>}, {transform_indices = @transform_1, window_bounds = array<i64: 256, 128>}, {transform_indices = @transform_2, window_bounds = array<i64: 256, 128>}]} {
    %c0_i32 = arith.constant 0 : i32
    %0 = arith.cmpi eq, %arg2, %c0_i32 : i32
    %1 = arith.extui %0 : i1 to i32
    %c0_i32_0 = arith.constant 0 : i32
    %2 = arith.cmpi ne, %1, %c0_i32_0 : i32
    scf.if %2 {
      %cst = arith.constant 0.000000e+00 : f32
      %9 = vector.broadcast %cst : f32 to vector<256x128xf32>
      %c0 = arith.constant 0 : index
      %c0_3 = arith.constant 0 : index
      %10 = vector.load %arg6[%c0, %c0_3] : memref<256x128xf32, #tpu.memory_space<vmem>>, vector<256x128xf32>
      tpu.vector_store %arg6[%c0, %c0_3], %9 {strides = array<i32>} : memref<256x128xf32, #tpu.memory_space<vmem>>, vector<256x128xf32>,
    } else {
    }
    %3 = arith.index_cast %arg0 : i32 to index
    %4 = arith.index_cast %arg2 : i32 to index
    %5 = memref.load %arg3[%3, %4] : memref<1x1xi32, #tpu.memory_space<smem>>
    %c0_i32_1 = arith.constant 0 : i32
    %6 = arith.cmpi ne, %5, %c0_i32_1 : i32
    %7 = arith.extui %6 : i1 to i32
    %c0_i32_2 = arith.constant 0 : i32
    %8 = arith.cmpi ne, %7, %c0_i32_2 : i32
    scf.if %8 {
      %c0 = arith.constant 0 : index
      %c0_3 = arith.constant 0 : index
      %9 = vector.load %arg6[%c0, %c0_3] : memref<256x128xf32, #tpu.memory_space<vmem>>, vector<256x128xf32>
      %c0_4 = arith.constant 0 : index
      %c0_5 = arith.constant 0 : index
      %10 = vector.load %arg4[%c0_4, %c0_5] : memref<256x256xf32, #tpu.memory_space<vmem>>, vector<256x256xf32>
      %c0_6 = arith.constant 0 : index
      %c0_7 = arith.constant 0 : index
      %11 = vector.load %arg5[%c0_6, %c0_7] : memref<256x128xf32, #tpu.memory_space<vmem>>, vector<256x128xf32>
      %cst = arith.constant dense<0.000000e+00> : vector<256x128xf32>
      %12 = tpu.matmul %10, %11, %cst {dimension_numbers = #tpu.dot_dimension_numbers<[1], [0], [0], [1], [0, 0, 1, 1], [], []>} : vector<256x256xf32>, vector<256x128xf32>, vector<256x128xf32> -> vector<256x128xf32>
      %13 = arith.addf %9, %12 : vector<256x128xf32>
      %c0_8 = arith.constant 0 : index
      %c0_9 = arith.constant 0 : index
      %14 = vector.load %arg6[%c0_8, %c0_9] : memref<256x128xf32, #tpu.memory_space<vmem>>, vector<256x128xf32>
      tpu.vector_store %arg6[%c0_8, %c0_9], %13 {strides = array<i32>} : memref<256x128xf32, #tpu.memory_space<vmem>>, vector<256x128xf32>,
    } else {
    }
    return
  }
  func.func @transform_0(%arg0: i32, %arg1: i32, %arg2: i32, %arg3: memref<1x1xi32, #tpu.memory_space<smem>>) -> (i32, i32) {
    %c0_i32 = arith.constant 0 : i32
    return %arg0, %arg2 : i32, i32
  }
  func.func @transform_1(%arg0: i32, %arg1: i32, %arg2: i32, %arg3: memref<1x1xi32, #tpu.memory_space<smem>>) -> (i32, i32) {
    %c0_i32 = arith.constant 0 : i32
    return %arg2, %arg1 : i32, i32
  }
  func.func @transform_2(%arg0: i32, %arg1: i32, %arg2: i32, %arg3: memref<1x1xi32, #tpu.memory_space<smem>>) -> (i32, i32) {
    %c0_i32 = arith.constant 0 : i32
    return %arg0, %arg1 : i32, i32
  }
}

</mosaic_0001>

<bundles_post_ra>
// kernel: tpu_custom_call.1
= control target key start
LH: loop header
LB: loop body
LE: loop exit
PB: predicated region body
PF: predicated region fallthrough
CT: control target
= control target key end

     0   :  { %9 = vsyncpa [#allocation5], 0  ;;  %s772_s0 = inlined_call_operand.<no memory space> [shape: s32[1,1], index: 0, kind: input, shape index: {}]   ;;  %s773_s1 = inlined_call_operand.hbm [shape: f32[256,256], index: 1, kind: input, shape index: {}]   ;;  %s774_s2 = inlined_call_operand.hbm [shape: f32[256,128], index: 2, kind: input, shape index: {}]   ;;  %s775_s3 = inlined_call_operand.hbm [shape: f32[256,128], index: 3, kind: output, shape index: {}]  }
   0x1   :  { %10 = vsyncpa [#allocation8], 0 }
   0x2   :  { %11 = vsyncpa [#allocation6], 0  ;;  %s661_s12 = smov [#allocation4]  }
   0x3   :  { %s17_s13 = sshll.u32 %s661_s12, 4  ;;  %s18_s13 = int_to_ptr.vmem [resolvable:$true] %s17_s13 }
   0x4   :  { %s603_s14 = scalar_lea.vmem %s18_s13, 8192  ;;  %p608_p1 = scmp.lt.s32.totalorder %s18_s13, %s18_s13 }
   0x5   :  { %p604_p0 = scmp.ne.s32.totalorder %s18_s13, %s603_s14  ;;  %p609_p2 = scmp.lt.s32.totalorder %s603_s14, %s603_s14 }
   0x7   :  { %p610_p3 = por %p609_p2, %p608_p1 }
   0x9   :  { %p611_p4 = pnand %p610_p3, %p604_p0 }
   0xb   :  { %614 = shalt.err (!%p611_p4)
}
   0xc   :  { %s662_s15 = smov 256   ;;  %s663_s16 = smov 16  }
   0xd   :  { %23 = dma.hbm_to_vmem [thread:$0]  %s773_s1, 8192, %s18_s13, [#allocation5], %s662_s15, %s662_s15, %s663_s16  }
   0xe   :  { %s664_s19 = smov [#allocation7]  }
   0xf   :  { %s29_s20 = sshll.u32 %s664_s19, 4  ;;  %s30_s20 = int_to_ptr.vmem [resolvable:$true] %s29_s20 }
  0x10   :  { %s623_s21 = scalar_lea.vmem %s30_s20, 4096  ;;  %p628_p6 = scmp.lt.s32.totalorder %s30_s20, %s30_s20 }
  0x11   :  { %p624_p5 = scmp.ne.s32.totalorder %s30_s20, %s623_s21  ;;  %p629_p7 = scmp.lt.s32.totalorder %s623_s21, %s623_s21 }
  0x13   :  { %p630_p8 = por %p629_p7, %p628_p6 }
  0x15   :  { %p631_p9 = pnand %p630_p8, %p624_p5 }
  0x17   :  { %634 = shalt.err (!%p631_p9)
}
  0x18   :  { %s665_s22 = smov 128   ;;  %s666_s23 = smov 8  }
  0x19   :  { %35 = dma.hbm_to_vmem [thread:$0]  %s774_s2, 4096, %s30_s20, [#allocation8], %s665_s22, %s665_s22, %s666_s23  }
  0x1a   :  { %655 = dma.done.wait [#allocation5], 8192  }
  0x1b   :  { %656 = vsyncadd [#allocation5], 4294959104 }
  0x1c   :  { %657 = dma.done.wait [#allocation8], 4096  }
  0x1d   :  { %658 = vsyncadd [#allocation8], 4294963200  ;;  %v667_v0 = vmov 0.0   ;;  %p521_p10 = scmp.eq.s32.totalorder %s772_s0, 0 }
  0x1e   :  { %46 = vst [vmem:[#allocation9] sm:$0xff] %v667_v0  ;;  %47 = vst [vmem:[#allocation9 + $0x8] sm:$0xff] %v667_v0 }
  0x1f   :  { %48 = vst [vmem:[#allocation9 + $0x10] sm:$0xff] %v667_v0  ;;  %49 = vst [vmem:[#allocation9 + $0x18] sm:$0xff] %v667_v0 }
  0x20   :  { %50 = vst [vmem:[#allocation9 + $0x20] sm:$0xff] %v667_v0  ;;  %51 = vst [vmem:[#allocation9 + $0x28] sm:$0xff] %v667_v0 }
  0x21   :  { %52 = vst [vmem:[#allocation9 + $0x30] sm:$0xff] %v667_v0  ;;  %53 = vst [vmem:[#allocation9 + $0x38] sm:$0xff] %v667_v0 }
  0x22   :  { %54 = vst [vmem:[#allocation9 + $0x40] sm:$0xff] %v667_v0  ;;  %55 = vst [vmem:[#allocation9 + $0x48] sm:$0xff] %v667_v0 }
  0x23   :  { %56 = vst [vmem:[#allocation9 + $0x50] sm:$0xff] %v667_v0  ;;  %57 = vst [vmem:[#allocation9 + $0x58] sm:$0xff] %v667_v0 }
  0x24   :  { %58 = vst [vmem:[#allocation9 + $0x60] sm:$0xff] %v667_v0  ;;  %59 = vst [vmem:[#allocation9 + $0x68] sm:$0xff] %v667_v0 }
  0x25   :  { %60 = vst [vmem:[#allocation9 + $0x70] sm:$0xff] %v667_v0  ;;  %61 = vst [vmem:[#allocation9 + $0x78] sm:$0xff] %v667_v0 }
  0x26   :  { %62 = vst [vmem:[#allocation9 + $0x80] sm:$0xff] %v667_v0  ;;  %63 = vst [vmem:[#allocation9 + $0x88] sm:$0xff] %v667_v0 }
  0x27   :  { %64 = vst [vmem:[#allocation9 + $0x90] sm:$0xff] %v667_v0  ;;  %65 = vst [vmem:[#allocation9 + $0x98] sm:$0xff] %v667_v0 }
  0x28   :  { %66 = vst [vmem:[#allocation9 + $0xa0] sm:$0xff] %v667_v0  ;;  %67 = vst [vmem:[#allocation9 + $0xa8] sm:$0xff] %v667_v0 }
  0x29   :  { %68 = vst [vmem:[#allocation9 + $0xb0] sm:$0xff] %v667_v0  ;;  %69 = vst [vmem:[#allocation9 + $0xb8] sm:$0xff] %v667_v0  ;;  %85 = sbr.rel (%p521_p10) target bundleno = 368 (0x170), region = 25 }
  0x2a   :  { %70 = vst [vmem:[#allocation9 + $0xc0] sm:$0xff] %v667_v0  ;;  %71 = vst [vmem:[#allocation9 + $0xc8] sm:$0xff] %v667_v0 }
  0x2b   :  { %72 = vst [vmem:[#allocation9 + $0xd0] sm:$0xff] %v667_v0  ;;  %73 = vst [vmem:[#allocation9 + $0xd8] sm:$0xff] %v667_v0 }
  0x2c   :  { %74 = vst [vmem:[#allocation9 + $0xe0] sm:$0xff] %v667_v0  ;;  %75 = vst [vmem:[#allocation9 + $0xe8] sm:$0xff] %v667_v0 }
  0x2d   :  { %76 = vst [vmem:[#allocation9 + $0xf0] sm:$0xff] %v667_v0  ;;  %77 = vst [vmem:[#allocation9 + $0xf8] sm:$0xff] %v667_v0 }
  0x2e   :  { %v197_v1 = vld [vmem:[#allocation7 + $0x78] sm:$0xff]  ;;  %v668_v2 = vmov 0.0   ;;  %v196_v3 = vld [vmem:[#allocation7 + $0x70] sm:$0xff]  ;;  %v195_v4 = vld [vmem:[#allocation7 + $0x68] sm:$0xff] }
  0x2f   :  { %214 = vmatprep.subr.mxu0 %v668_v2  ;;  %522 = vmatprep.subr.mxu1 %v668_v2  ;;  %v194_v5 = vld [vmem:[#allocation7 + $0x60] sm:$0xff]  ;;  %v193_v6 = vld [vmem:[#allocation7 + $0x58] sm:$0xff]  ;;  %v192_v7 = vld [vmem:[#allocation7 + $0x50] sm:$0xff] }
  0x30   :  { %215 = vmatpush1.msra.mxu0 %v197_v1  ;;  %554 = vmatpush1.msra.mxu1 %v197_v1  ;;  %v191_v8 = vld [vmem:[#allocation7 + $0x48] sm:$0xff]  ;;  %v190_v9 = vld [vmem:[#allocation7 + $0x40] sm:$0xff]  ;;  %v189_v10 = vld [vmem:[#allocation7 + $0x38] sm:$0xff] }
  0x31   :  { %216 = vmatprep.subr.mxu0 %v668_v2  ;;  %523 = vmatprep.subr.mxu1 %v668_v2  ;;  %v188_v11 = vld [vmem:[#allocation7 + $0x30] sm:$0xff]  ;;  %v187_v12 = vld [vmem:[#allocation7 + $0x28] sm:$0xff]  ;;  %v186_v13 = vld [vmem:[#allocation7 + $0x20] sm:$0xff] }
  0x32   :  { %217 = vmatpush1.msra.mxu0 %v196_v3  ;;  %555 = vmatpush1.msra.mxu1 %v196_v3  ;;  %v185_v14 = vld [vmem:[#allocation7 + $0x18] sm:$0xff]  ;;  %v184_v15 = vld [vmem:[#allocation7 + $0x10] sm:$0xff]  ;;  %v183_v16 = vld [vmem:[#allocation7 + $0x8] sm:$0xff] }
  0x33   :  { %218 = vmatprep.subr.mxu0 %v668_v2  ;;  %524 = vmatprep.subr.mxu1 %v668_v2  ;;  %v182_v17 = vld [vmem:[#allocation7] sm:$0xff]  ;;  %v213_v18 = vld [vmem:[#allocation7 + $0xf8] sm:$0xff]  ;;  %v212_v19 = vld [vmem:[#allocation7 + $0xf0] sm:$0xff] }
  0x34   :  { %219 = vmatpush1.msra.mxu0 %v195_v4  ;;  %556 = vmatpush1.msra.mxu1 %v195_v4  ;;  %v211_v20 = vld [vmem:[#allocation7 + $0xe8] sm:$0xff]  ;;  %v210_v21 = vld [vmem:[#allocation7 + $0xe0] sm:$0xff]  ;;  %v209_v22 = vld [vmem:[#allocation7 + $0xd8] sm:$0xff] }
  0x35   :  { %220 = vmatprep.subr.mxu0 %v668_v2  ;;  %525 = vmatprep.subr.mxu1 %v668_v2  ;;  %v208_v23 = vld [vmem:[#allocation7 + $0xd0] sm:$0xff]  ;;  %v207_v24 = vld [vmem:[#allocation7 + $0xc8] sm:$0xff]  ;;  %v206_v25 = vld [vmem:[#allocation7 + $0xc0] sm:$0xff] }
  0x36   :  { %221 = vmatpush1.msra.mxu0 %v194_v5  ;;  %557 = vmatpush1.msra.mxu1 %v194_v5  ;;  %v205_v26 = vld [vmem:[#allocation7 + $0xb8] sm:$0xff]  ;;  %v204_v27 = vld [vmem:[#allocation7 + $0xb0] sm:$0xff]  ;;  %v203_v28 = vld [vmem:[#allocation7 + $0xa8] sm:$0xff] }
  0x37   :  { %222 = vmatprep.subr.mxu0 %v668_v2  ;;  %526 = vmatprep.subr.mxu1 %v668_v2  ;;  %v202_v29 = vld [vmem:[#allocation7 + $0xa0] sm:$0xff]  ;;  %v201_v30 = vld [vmem:[#allocation7 + $0x98] sm:$0xff]  ;;  %v200_v31 = vld [vmem:[#allocation7 + $0x90] sm:$0xff] }
  0x38   :  { %223 = vmatpush1.msra.mxu0 %v193_v6  ;;  %558 = vmatpush1.msra.mxu1 %v193_v6  ;;  %v199_v32 = vld [vmem:[#allocation7 + $0x88] sm:$0xff]  ;;  %v198_v33 = vld [vmem:[#allocation7 + $0x80] sm:$0xff]  ;;  %v121_v38 = vld [vmem:[#allocation4 + $0x18] sm:$0xff] }
  0x39   :  { %224 = vmatprep.subr.mxu0 %v668_v2  ;;  %527 = vmatprep.subr.mxu1 %v668_v2  ;;  %v119_v34 = vld [vmem:[#allocation4 + $0x8] sm:$0xff]  ;;  %v118_v36 = vld [vmem:[#allocation4] sm:$0xff]  ;;  %v153_v39 = vld [vmem:[#allocation4 + $0x118] sm:$0xff] }
  0x3a   :  { %225 = vmatpush1.msra.mxu0 %v192_v7  ;;  %559 = vmatpush1.msra.mxu1 %v192_v7  ;;  %v151_v35 = vld [vmem:[#allocation4 + $0x108] sm:$0xff]  ;;  %v150_v37 = vld [vmem:[#allocation4 + $0x100] sm:$0xff]  ;;  %v120_v40 = vld [vmem:[#allocation4 + $0x10] sm:$0xff] }
  0x3b   :  { %226 = vmatprep.subr.mxu0 %v668_v2  ;;  %528 = vmatprep.subr.mxu1 %v668_v2  ;;  %v152_v41 = vld [vmem:[#allocation4 + $0x110] sm:$0xff]  ;;  %v123_v42 = vld [vmem:[#allocation4 + $0x28] sm:$0xff]  ;;  %v122_v44 = vld [vmem:[#allocation4 + $0x20] sm:$0xff] }
  0x3c   :  { %227 = vmatpush1.msra.mxu0 %v191_v8  ;;  %560 = vmatpush1.msra.mxu1 %v191_v8  ;;  %v155_v43 = vld [vmem:[#allocation4 + $0x128] sm:$0xff]  ;;  %v154_v45 = vld [vmem:[#allocation4 + $0x120] sm:$0xff]  ;;  %v125_v46 = vld [vmem:[#allocation4 + $0x38] sm:$0xff] }
  0x3d   :  { %228 = vmatprep.subr.mxu0 %v668_v2  ;;  %529 = vmatprep.subr.mxu1 %v668_v2  ;;  %v157_v47 = vld [vmem:[#allocation4 + $0x138] sm:$0xff]  ;;  %v124_v48 = vld [vmem:[#allocation4 + $0x30] sm:$0xff]  ;;  %v127_v50 = vld [vmem:[#allocation4 + $0x48] sm:$0xff] }
  0x3e   :  { %229 = vmatpush1.msra.mxu0 %v190_v9  ;;  %561 = vmatpush1.msra.mxu1 %v190_v9  ;;  %v156_v49 = vld [vmem:[#allocation4 + $0x130] sm:$0xff]  ;;  %v159_v51 = vld [vmem:[#allocation4 + $0x148] sm:$0xff]  ;;  %v126_v52 = vld [vmem:[#allocation4 + $0x40] sm:$0xff] }
  0x3f   :  { %230 = vmatprep.subr.mxu0 %v668_v2  ;;  %530 = vmatprep.subr.mxu1 %v668_v2  ;;  %v158_v53 = vld [vmem:[#allocation4 + $0x140] sm:$0xff]  ;;  %v129_v54 = vld [vmem:[#allocation4 + $0x58] sm:$0xff]  ;;  %v128_v56 = vld [vmem:[#allocation4 + $0x50] sm:$0xff] }
  0x40   :  { %231 = vmatpush1.msra.mxu0 %v189_v10  ;;  %562 = vmatpush1.msra.mxu1 %v189_v10  ;;  %v161_v55 = vld [vmem:[#allocation4 + $0x158] sm:$0xff]  ;;  %v160_v57 = vld [vmem:[#allocation4 + $0x150] sm:$0xff]  ;;  %v131_v58 = vld [vmem:[#allocation4 + $0x68] sm:$0xff] }
  0x41   :  { %232 = vmatprep.subr.mxu0 %v668_v2  ;;  %531 = vmatprep.subr.mxu1 %v668_v2  ;;  %v163_v59 = vld [vmem:[#allocation4 + $0x168] sm:$0xff]  ;;  %v130_v60 = vld [vmem:[#allocation4 + $0x60] sm:$0xff]  ;;  %v133_v62 = vld [vmem:[#allocation4 + $0x78] sm:$0xff] }
  0x42   :  { %233 = vmatpush1.msra.mxu0 %v188_v11  ;;  %563 = vmatpush1.msra.mxu1 %v188_v11  ;;  %v162_v61 = vld [vmem:[#allocation4 + $0x160] sm:$0xff]  ;;  %v165_v63 = vld [vmem:[#allocation4 + $0x178] sm:$0xff]  ;;  %v132_v0 = vld [vmem:[#allocation4 + $0x70] sm:$0xff] }
  0x43   :  { %234 = vmatprep.subr.mxu0 %v668_v2  ;;  %532 = vmatprep.subr.mxu1 %v668_v2  ;;  %v164_v1 = vld [vmem:[#allocation4 + $0x170] sm:$0xff]  ;;  %v167_v3 = vld [vmem:[#allocation4 + $0x188] sm:$0xff]  ;;  %v134_v4 = vld [vmem:[#allocation4 + $0x80] sm:$0xff] }
  0x44   :  { %235 = vmatpush1.msra.mxu0 %v187_v12  ;;  %564 = vmatpush1.msra.mxu1 %v187_v12  ;;  %v166_v5 = vld [vmem:[#allocation4 + $0x180] sm:$0xff]  ;;  %v137_v6 = vld [vmem:[#allocation4 + $0x98] sm:$0xff]  ;;  %v136_v8 = vld [vmem:[#allocation4 + $0x90] sm:$0xff] }
  0x45   :  { %236 = vmatprep.subr.mxu0 %v668_v2  ;;  %533 = vmatprep.subr.mxu1 %v668_v2  ;;  %v169_v7 = vld [vmem:[#allocation4 + $0x198] sm:$0xff]  ;;  %v168_v9 = vld [vmem:[#allocation4 + $0x190] sm:$0xff]  ;;  %v139_v10 = vld [vmem:[#allocation4 + $0xa8] sm:$0xff] }
  0x46   :  { %237 = vmatpush1.msra.mxu0 %v186_v13  ;;  %565 = vmatpush1.msra.mxu1 %v186_v13  ;;  %v171_v11 = vld [vmem:[#allocation4 + $0x1a8] sm:$0xff]  ;;  %v138_v12 = vld [vmem:[#allocation4 + $0xa0] sm:$0xff] }
  0x47   :  { %238 = vmatprep.subr.mxu0 %v668_v2  ;;  %534 = vmatprep.subr.mxu1 %v668_v2  ;;  %v170_v13 = vld [vmem:[#allocation4 + $0x1a0] sm:$0xff] }
  0x48   :  { %239 = vmatpush1.msra.mxu0 %v185_v14  ;;  %566 = vmatpush1.msra.mxu1 %v185_v14  ;;  %v141_v14 = vld [vmem:[#allocation4 + $0xb8] sm:$0xff] }
  0x49   :  { %240 = vmatprep.subr.mxu0 %v668_v2  ;;  %535 = vmatprep.subr.mxu1 %v668_v2 }
  0x4a   :  { %241 = vmatpush1.msra.mxu0 %v184_v15  ;;  %567 = vmatpush1.msra.mxu1 %v184_v15  ;;  %v173_v15 = vld [vmem:[#allocation4 + $0x1b8] sm:$0xff] }
  0x4b   :  { %242 = vmatprep.subr.mxu0 %v668_v2  ;;  %536 = vmatprep.subr.mxu1 %v668_v2 }
  0x4c   :  { %243 = vmatpush1.msra.mxu0 %v183_v16  ;;  %568 = vmatpush1.msra.mxu1 %v183_v16  ;;  %v140_v16 = vld [vmem:[#allocation4 + $0xb0] sm:$0xff] }
  0x4d   :  { %244 = vmatprep.subr.mxu0 %v668_v2  ;;  %537 = vmatprep.subr.mxu1 %v668_v2 }
  0x4e   :  { %245 = vmatpush1.msra.mxu0 %v182_v17  ;;  %569 = vmatpush1.msra.mxu1 %v182_v17  ;;  %v172_v17 = vld [vmem:[#allocation4 + $0x1b0] sm:$0xff] }
  0x4f   :  { %246 = vmatprep.subr.mxu0 %v668_v2  ;;  %538 = vmatprep.subr.mxu1 %v668_v2 }
  0x50   :  { %247 = vmatpush2.msra.mxu0 %v213_v18  ;;  %570 = vmatpush2.msra.mxu1 %v213_v18  ;;  %v143_v18 = vld [vmem:[#allocation4 + $0xc8] sm:$0xff] }
  0x51   :  { %248 = vmatprep.subr.mxu0 %v668_v2  ;;  %539 = vmatprep.subr.mxu1 %v668_v2 }
  0x52   :  { %249 = vmatpush2.msra.mxu0 %v212_v19  ;;  %571 = vmatpush2.msra.mxu1 %v212_v19  ;;  %v175_v19 = vld [vmem:[#allocation4 + $0x1c8] sm:$0xff] }
  0x53   :  { %250 = vmatprep.subr.mxu0 %v668_v2  ;;  %540 = vmatprep.subr.mxu1 %v668_v2 }
  0x54   :  { %251 = vmatpush2.msra.mxu0 %v211_v20  ;;  %572 = vmatpush2.msra.mxu1 %v211_v20  ;;  %v142_v20 = vld [vmem:[#allocation4 + $0xc0] sm:$0xff] }
  0x55   :  { %252 = vmatprep.subr.mxu0 %v668_v2  ;;  %541 = vmatprep.subr.mxu1 %v668_v2 }
  0x56   :  { %253 = vmatpush2.msra.mxu0 %v210_v21  ;;  %573 = vmatpush2.msra.mxu1 %v210_v21  ;;  %v174_v21 = vld [vmem:[#allocation4 + $0x1c0] sm:$0xff] }
  0x57   :  { %254 = vmatprep.subr.mxu0 %v668_v2  ;;  %542 = vmatprep.subr.mxu1 %v668_v2 }
  0x58   :  { %255 = vmatpush2.msra.mxu0 %v209_v22  ;;  %574 = vmatpush2.msra.mxu1 %v209_v22  ;;  %v145_v22 = vld [vmem:[#allocation4 + $0xd8] sm:$0xff] }
  0x59   :  { %256 = vmatprep.subr.mxu0 %v668_v2  ;;  %543 = vmatprep.subr.mxu1 %v668_v2 }
  0x5a   :  { %257 = vmatpush2.msra.mxu0 %v208_v23  ;;  %575 = vmatpush2.msra.mxu1 %v208_v23  ;;  %v177_v23 = vld [vmem:[#allocation4 + $0x1d8] sm:$0xff] }
  0x5b   :  { %258 = vmatprep.subr.mxu0 %v668_v2  ;;  %544 = vmatprep.subr.mxu1 %v668_v2 }
  0x5c   :  { %259 = vmatpush2.msra.mxu0 %v207_v24  ;;  %576 = vmatpush2.msra.mxu1 %v207_v24  ;;  %v144_v24 = vld [vmem:[#allocation4 + $0xd0] sm:$0xff] }
  0x5d   :  { %260 = vmatprep.subr.mxu0 %v668_v2  ;;  %545 = vmatprep.subr.mxu1 %v668_v2 }
  0x5e   :  { %261 = vmatpush2.msra.mxu0 %v206_v25  ;;  %577 = vmatpush2.msra.mxu1 %v206_v25  ;;  %v176_v25 = vld [vmem:[#allocation4 + $0x1d0] sm:$0xff] }
  0x5f   :  { %262 = vmatprep.subr.mxu0 %v668_v2  ;;  %546 = vmatprep.subr.mxu1 %v668_v2 }
  0x60   :  { %263 = vmatpush2.msra.mxu0 %v205_v26  ;;  %578 = vmatpush2.msra.mxu1 %v205_v26  ;;  %v147_v26 = vld [vmem:[#allocation4 + $0xe8] sm:$0xff] }
  0x61   :  { %264 = vmatprep.subr.mxu0 %v668_v2  ;;  %547 = vmatprep.subr.mxu1 %v668_v2 }
  0x62   :  { %265 = vmatpush2.msra.mxu0 %v204_v27  ;;  %579 = vmatpush2.msra.mxu1 %v204_v27  ;;  %v179_v27 = vld [vmem:[#allocation4 + $0x1e8] sm:$0xff] }
  0x63   :  { %266 = vmatprep.subr.mxu0 %v668_v2  ;;  %548 = vmatprep.subr.mxu1 %v668_v2 }
  0x64   :  { %267 = vmatpush2.msra.mxu0 %v203_v28  ;;  %580 = vmatpush2.msra.mxu1 %v203_v28  ;;  %v146_v28 = vld [vmem:[#allocation4 + $0xe0] sm:$0xff] }
  0x65   :  { %268 = vmatprep.subr.mxu0 %v668_v2  ;;  %549 = vmatprep.subr.mxu1 %v668_v2 }
  0x66   :  { %269 = vmatpush2.msra.mxu0 %v202_v29  ;;  %581 = vmatpush2.msra.mxu1 %v202_v29  ;;  %v178_v29 = vld [vmem:[#allocation4 + $0x1e0] sm:$0xff] }
  0x67   :  { %270 = vmatprep.subr.mxu0 %v668_v2  ;;  %550 = vmatprep.subr.mxu1 %v668_v2 }
  0x68   :  { %271 = vmatpush2.msra.mxu0 %v201_v30  ;;  %582 = vmatpush2.msra.mxu1 %v201_v30  ;;  %v149_v30 = vld [vmem:[#allocation4 + $0xf8] sm:$0xff] }
  0x69   :  { %272 = vmatprep.subr.mxu0 %v668_v2  ;;  %551 = vmatprep.subr.mxu1 %v668_v2 }
  0x6a   :  { %273 = vmatpush2.msra.mxu0 %v200_v31  ;;  %583 = vmatpush2.msra.mxu1 %v200_v31  ;;  %v181_v31 = vld [vmem:[#allocation4 + $0x1f8] sm:$0xff] }
  0x6b   :  { %274 = vmatprep.subr.mxu0 %v668_v2  ;;  %552 = vmatprep.subr.mxu1 %v668_v2 }
  0x6c   :  { %275 = vmatpush2.msra.mxu0 %v199_v32  ;;  %584 = vmatpush2.msra.mxu1 %v199_v32  ;;  %v148_v32 = vld [vmem:[#allocation4 + $0xf0] sm:$0xff] }
  0x6d   :  { %276 = vmatprep.subr.mxu0 %v668_v2  ;;  %553 = vmatprep.subr.mxu1 %v668_v2  ;;  %v135_v2 = vld [vmem:[#allocation4 + $0x88] sm:$0xff] }
  0x6e   :  { %277 = vmatpush2.msra.mxu0 %v198_v33  ;;  %585 = vmatpush2.msra.mxu1 %v198_v33  ;;  %v180_v33 = vld [vmem:[#allocation4 + $0x1f0] sm:$0xff] }
  0x6f   :  { %278 = vmatprep.mubr.f32.mxu0 %v119_v34  ;;  %358 = vmatprep.mubr.f32.mxu1 %v151_v35  ;;  %v86_v34 = vld [vmem:[#allocation9] sm:$0xff] }
  0x70   :  { %279 = vmatmul.mubr.f32.vlgmr.msra.gmra.mxu0 %v118_v36  ;;  %359 = vmatmul.mubr.f32.vlgmr.msra.gmra.mxu1 %v150_v37  ;;  %v102_v35 = vld [vmem:[#allocation9 + $0x80] sm:$0xff] }
  0x71   :  { %283 = vmatprep.mubr.f32.mxu0 %v121_v38  ;;  %363 = vmatprep.mubr.f32.mxu1 %v153_v39 }
  0x74   :  { %284 = vmatmul.mubr.f32.gmra.mxu0 %v120_v40  ;;  %364 = vmatmul.mubr.f32.gmra.mxu1 %v152_v41 }
  0x75   :  { %288 = vmatprep.mubr.f32.mxu0 %v123_v42  ;;  %368 = vmatprep.mubr.f32.mxu1 %v155_v43  ;;  %v87_v42 = vld [vmem:[#allocation9 + $0x8] sm:$0xff] }
  0x76   :  { %v103_v43 = vld [vmem:[#allocation9 + $0x88] sm:$0xff] }
  0x78   :  { %289 = vmatmul.mubr.f32.gmra.mxu0 %v122_v44  ;;  %369 = vmatmul.mubr.f32.gmra.mxu1 %v154_v45 }
  0x79   :  { %293 = vmatprep.mubr.f32.mxu0 %v125_v46  ;;  %373 = vmatprep.mubr.f32.mxu1 %v157_v47 }
  0x7c   :  { %294 = vmatmul.mubr.f32.gmra.mxu0 %v124_v48  ;;  %374 = vmatmul.mubr.f32.gmra.mxu1 %v156_v49 }
  0x7d   :  { %298 = vmatprep.mubr.f32.mxu0 %v127_v50  ;;  %378 = vmatprep.mubr.f32.mxu1 %v159_v51  ;;  %v88_v50 = vld [vmem:[#allocation9 + $0x10] sm:$0xff] }
  0x7e   :  { %v104_v51 = vld [vmem:[#allocation9 + $0x90] sm:$0xff] }
  0x80   :  { %299 = vmatmul.mubr.f32.gmra.mxu0 %v126_v52  ;;  %379 = vmatmul.mubr.f32.gmra.mxu1 %v158_v53 }
  0x81   :  { %303 = vmatprep.mubr.f32.mxu0 %v129_v54  ;;  %383 = vmatprep.mubr.f32.mxu1 %v161_v55 }
  0x84   :  { %304 = vmatmul.mubr.f32.gmra.mxu0 %v128_v56  ;;  %384 = vmatmul.mubr.f32.gmra.mxu1 %v160_v57 }
  0x85   :  { %308 = vmatprep.mubr.f32.mxu0 %v131_v58  ;;  %388 = vmatprep.mubr.f32.mxu1 %v163_v59  ;;  %v89_v58 = vld [vmem:[#allocation9 + $0x18] sm:$0xff] }
  0x86   :  { %v105_v59 = vld [vmem:[#allocation9 + $0x98] sm:$0xff] }
  0x88   :  { %309 = vmatmul.mubr.f32.gmra.mxu0 %v130_v60  ;;  %389 = vmatmul.mubr.f32.gmra.mxu1 %v162_v61 }
  0x89   :  { %313 = vmatprep.mubr.f32.mxu0 %v133_v62  ;;  %393 = vmatprep.mubr.f32.mxu1 %v165_v63 }
  0x8c   :  { %314 = vmatmul.mubr.f32.gmra.mxu0 %v132_v0  ;;  %394 = vmatmul.mubr.f32.gmra.mxu1 %v164_v1 }
  0x8d   :  { %318 = vmatprep.mubr.f32.mxu0 %v135_v2  ;;  %398 = vmatprep.mubr.f32.mxu1 %v167_v3  ;;  %v90_v2 = vld [vmem:[#allocation9 + $0x20] sm:$0xff] }
  0x8e   :  { %v106_v3 = vld [vmem:[#allocation9 + $0xa0] sm:$0xff] }
  0x90   :  { %319 = vmatmul.mubr.f32.gmra.mxu0 %v134_v4  ;;  %399 = vmatmul.mubr.f32.gmra.mxu1 %v166_v5 }
  0x91   :  { %323 = vmatprep.mubr.f32.mxu0 %v137_v6  ;;  %403 = vmatprep.mubr.f32.mxu1 %v169_v7 }
  0x94   :  { %324 = vmatmul.mubr.f32.gmra.mxu0 %v136_v8  ;;  %404 = vmatmul.mubr.f32.gmra.mxu1 %v168_v9 }
  0x95   :  { %328 = vmatprep.mubr.f32.mxu0 %v139_v10  ;;  %408 = vmatprep.mubr.f32.mxu1 %v171_v11  ;;  %v91_v10 = vld [vmem:[#allocation9 + $0x28] sm:$0xff] }
  0x96   :  { %v107_v11 = vld [vmem:[#allocation9 + $0xa8] sm:$0xff] }
  0x98   :  { %329 = vmatmul.mubr.f32.gmra.mxu0 %v138_v12  ;;  %409 = vmatmul.mubr.f32.gmra.mxu1 %v170_v13 }
  0x99   :  { %333 = vmatprep.mubr.f32.mxu0 %v141_v14  ;;  %413 = vmatprep.mubr.f32.mxu1 %v173_v15 }
  0x9c   :  { %334 = vmatmul.mubr.f32.gmra.mxu0 %v140_v16  ;;  %414 = vmatmul.mubr.f32.gmra.mxu1 %v172_v17 }
  0x9d   :  { %338 = vmatprep.mubr.f32.mxu0 %v143_v18  ;;  %418 = vmatprep.mubr.f32.mxu1 %v175_v19  ;;  %v92_v18 = vld [vmem:[#allocation9 + $0x30] sm:$0xff] }
  0x9e   :  { %v108_v19 = vld [vmem:[#allocation9 + $0xb0] sm:$0xff] }
  0xa0   :  { %339 = vmatmul.mubr.f32.gmra.mxu0 %v142_v20  ;;  %419 = vmatmul.mubr.f32.gmra.mxu1 %v174_v21 }
  0xa1   :  { %343 = vmatprep.mubr.f32.mxu0 %v145_v22  ;;  %423 = vmatprep.mubr.f32.mxu1 %v177_v23 }
  0xa4   :  { %344 = vmatmul.mubr.f32.gmra.mxu0 %v144_v24  ;;  %424 = vmatmul.mubr.f32.gmra.mxu1 %v176_v25 }
  0xa5   :  { %348 = vmatprep.mubr.f32.mxu0 %v147_v26  ;;  %428 = vmatprep.mubr.f32.mxu1 %v179_v27  ;;  %v93_v26 = vld [vmem:[#allocation9 + $0x38] sm:$0xff] }
  0xa6   :  { %v109_v27 = vld [vmem:[#allocation9 + $0xb8] sm:$0xff] }
  0xa8   :  { %349 = vmatmul.mubr.f32.gmra.mxu0 %v146_v28  ;;  %429 = vmatmul.mubr.f32.gmra.mxu1 %v178_v29 }
  0xa9   :  { %353 = vmatprep.mubr.f32.mxu0 %v149_v30  ;;  %433 = vmatprep.mubr.f32.mxu1 %v181_v31 }
  0xac   :  { %354 = vmatmul.mubr.f32.gmra.mxu0 %v148_v32  ;;  %434 = vmatmul.mubr.f32.gmra.mxu1 %v180_v33 }
 0x130   :  { %v280_v36 = vpop.f32.mrf.mxu0  ;;  %v360_v37 = vpop.f32.mrf.mxu1 }
 0x131   :  { %v439_v38 = vadd.f32 %v280_v36, %v86_v34  ;;  %v455_v39 = vadd.f32 %v360_v37, %v102_v35  ;;  %v94_v34 = vld [vmem:[#allocation9 + $0x40] sm:$0xff] }
 0x132   :  { %v282_v40 = vpop.f32.mrf.mxu0  ;;  %v362_v41 = vpop.f32.mrf.mxu1  ;;  %v110_v35 = vld [vmem:[#allocation9 + $0xc0] sm:$0xff] }
 0x133   :  { %471 = vst [vmem:[#allocation9] sm:$0xff] %v439_v38  ;;  %487 = vst [vmem:[#allocation9 + $0x80] sm:$0xff] %v455_v39 }
 0x134   :  { %v285_v44 = vpop.f32.mrf.mxu0  ;;  %v365_v45 = vpop.f32.mrf.mxu1 }
 0x135   :  { %v440_v46 = vadd.f32 %v285_v44, %v87_v42  ;;  %v456_v47 = vadd.f32 %v365_v45, %v103_v43  ;;  %v95_v42 = vld [vmem:[#allocation9 + $0x48] sm:$0xff] }
 0x136   :  { %v287_v48 = vpop.f32.mrf.mxu0  ;;  %v367_v49 = vpop.f32.mrf.mxu1  ;;  %v111_v43 = vld [vmem:[#allocation9 + $0xc8] sm:$0xff] }
 0x137   :  { %472 = vst [vmem:[#allocation9 + $0x8] sm:$0xff] %v440_v46  ;;  %488 = vst [vmem:[#allocation9 + $0x88] sm:$0xff] %v456_v47 }
 0x138   :  { %v290_v52 = vpop.f32.mrf.mxu0  ;;  %v370_v53 = vpop.f32.mrf.mxu1 }
 0x139   :  { %v441_v54 = vadd.f32 %v290_v52, %v88_v50  ;;  %v457_v55 = vadd.f32 %v370_v53, %v104_v51  ;;  %v96_v50 = vld [vmem:[#allocation9 + $0x50] sm:$0xff] }
 0x13a   :  { %v292_v56 = vpop.f32.mrf.mxu0  ;;  %v372_v57 = vpop.f32.mrf.mxu1  ;;  %v112_v51 = vld [vmem:[#allocation9 + $0xd0] sm:$0xff] }
 0x13b   :  { %473 = vst [vmem:[#allocation9 + $0x10] sm:$0xff] %v441_v54  ;;  %489 = vst [vmem:[#allocation9 + $0x90] sm:$0xff] %v457_v55 }
 0x13c   :  { %v295_v60 = vpop.f32.mrf.mxu0  ;;  %v375_v61 = vpop.f32.mrf.mxu1 }
 0x13d   :  { %v442_v62 = vadd.f32 %v295_v60, %v89_v58  ;;  %v458_v63 = vadd.f32 %v375_v61, %v105_v59  ;;  %v97_v58 = vld [vmem:[#allocation9 + $0x58] sm:$0xff] }
 0x13e   :  { %v297_v0 = vpop.f32.mrf.mxu0  ;;  %v377_v1 = vpop.f32.mrf.mxu1  ;;  %v113_v59 = vld [vmem:[#allocation9 + $0xd8] sm:$0xff] }
 0x13f   :  { %474 = vst [vmem:[#allocation9 + $0x18] sm:$0xff] %v442_v62  ;;  %490 = vst [vmem:[#allocation9 + $0x98] sm:$0xff] %v458_v63 }
 0x140   :  { %v300_v4 = vpop.f32.mrf.mxu0  ;;  %v380_v5 = vpop.f32.mrf.mxu1 }
 0x141   :  { %v443_v6 = vadd.f32 %v300_v4, %v90_v2  ;;  %v459_v7 = vadd.f32 %v380_v5, %v106_v3  ;;  %v98_v2 = vld [vmem:[#allocation9 + $0x60] sm:$0xff] }
 0x142   :  { %v302_v8 = vpop.f32.mrf.mxu0  ;;  %v382_v9 = vpop.f32.mrf.mxu1  ;;  %v114_v3 = vld [vmem:[#allocation9 + $0xe0] sm:$0xff] }
 0x143   :  { %475 = vst [vmem:[#allocation9 + $0x20] sm:$0xff] %v443_v6  ;;  %491 = vst [vmem:[#allocation9 + $0xa0] sm:$0xff] %v459_v7 }
 0x144   :  { %v305_v12 = vpop.f32.mrf.mxu0  ;;  %v385_v13 = vpop.f32.mrf.mxu1 }
 0x145   :  { %v444_v14 = vadd.f32 %v305_v12, %v91_v10  ;;  %v460_v15 = vadd.f32 %v385_v13, %v107_v11  ;;  %v99_v10 = vld [vmem:[#allocation9 + $0x68] sm:$0xff] }
 0x146   :  { %v307_v16 = vpop.f32.mrf.mxu0  ;;  %v387_v17 = vpop.f32.mrf.mxu1  ;;  %v115_v11 = vld [vmem:[#allocation9 + $0xe8] sm:$0xff] }
 0x147   :  { %476 = vst [vmem:[#allocation9 + $0x28] sm:$0xff] %v444_v14  ;;  %492 = vst [vmem:[#allocation9 + $0xa8] sm:$0xff] %v460_v15 }
 0x148   :  { %v310_v20 = vpop.f32.mrf.mxu0  ;;  %v390_v21 = vpop.f32.mrf.mxu1 }
 0x149   :  { %v445_v22 = vadd.f32 %v310_v20, %v92_v18  ;;  %v461_v23 = vadd.f32 %v390_v21, %v108_v19  ;;  %v100_v18 = vld [vmem:[#allocation9 + $0x70] sm:$0xff] }
 0x14a   :  { %v312_v24 = vpop.f32.mrf.mxu0  ;;  %v392_v25 = vpop.f32.mrf.mxu1  ;;  %v116_v19 = vld [vmem:[#allocation9 + $0xf0] sm:$0xff] }
 0x14b   :  { %477 = vst [vmem:[#allocation9 + $0x30] sm:$0xff] %v445_v22  ;;  %493 = vst [vmem:[#allocation9 + $0xb0] sm:$0xff] %v461_v23 }
 0x14c   :  { %v315_v28 = vpop.f32.mrf.mxu0  ;;  %v395_v29 = vpop.f32.mrf.mxu1 }
 0x14d   :  { %v446_v30 = vadd.f32 %v315_v28, %v93_v26  ;;  %v462_v31 = vadd.f32 %v395_v29, %v109_v27  ;;  %v101_v26 = vld [vmem:[#allocation9 + $0x78] sm:$0xff] }
 0x14e   :  { %v317_v32 = vpop.f32.mrf.mxu0  ;;  %v397_v33 = vpop.f32.mrf.mxu1  ;;  %v117_v27 = vld [vmem:[#allocation9 + $0xf8] sm:$0xff] }
 0x14f   :  { %478 = vst [vmem:[#allocation9 + $0x38] sm:$0xff] %v446_v30  ;;  %494 = vst [vmem:[#allocation9 + $0xb8] sm:$0xff] %v462_v31 }
 0x150   :  { %v320_v36 = vpop.f32.mrf.mxu0  ;;  %v400_v37 = vpop.f32.mrf.mxu1 }
 0x151   :  { %v447_v38 = vadd.f32 %v320_v36, %v94_v34  ;;  %v463_v39 = vadd.f32 %v400_v37, %v110_v35 }
 0x152   :  { %v322_v40 = vpop.f32.mrf.mxu0  ;;  %v402_v41 = vpop.f32.mrf.mxu1 }
 0x153   :  { %479 = vst [vmem:[#allocation9 + $0x40] sm:$0xff] %v447_v38  ;;  %495 = vst [vmem:[#allocation9 + $0xc0] sm:$0xff] %v463_v39 }
 0x154   :  { %v325_v44 = vpop.f32.mrf.mxu0  ;;  %v405_v45 = vpop.f32.mrf.mxu1 }
 0x155   :  { %v448_v46 = vadd.f32 %v325_v44, %v95_v42  ;;  %v464_v47 = vadd.f32 %v405_v45, %v111_v43 }
 0x156   :  { %v327_v48 = vpop.f32.mrf.mxu0  ;;  %v407_v49 = vpop.f32.mrf.mxu1 }
 0x157   :  { %480 = vst [vmem:[#allocation9 + $0x48] sm:$0xff] %v448_v46  ;;  %496 = vst [vmem:[#allocation9 + $0xc8] sm:$0xff] %v464_v47 }
 0x158   :  { %v330_v52 = vpop.f32.mrf.mxu0  ;;  %v410_v53 = vpop.f32.mrf.mxu1 }
 0x159   :  { %v449_v54 = vadd.f32 %v330_v52, %v96_v50  ;;  %v465_v55 = vadd.f32 %v410_v53, %v112_v51 }
 0x15a   :  { %v332_v56 = vpop.f32.mrf.mxu0  ;;  %v412_v57 = vpop.f32.mrf.mxu1 }
 0x15b   :  { %481 = vst [vmem:[#allocation9 + $0x50] sm:$0xff] %v449_v54  ;;  %497 = vst [vmem:[#allocation9 + $0xd0] sm:$0xff] %v465_v55 }
 0x15c   :  { %v335_v60 = vpop.f32.mrf.mxu0  ;;  %v415_v61 = vpop.f32.mrf.mxu1 }
 0x15d   :  { %v450_v62 = vadd.f32 %v335_v60, %v97_v58  ;;  %v466_v63 = vadd.f32 %v415_v61, %v113_v59 }
 0x15e   :  { %v337_v0 = vpop.f32.mrf.mxu0  ;;  %v417_v1 = vpop.f32.mrf.mxu1 }
 0x15f   :  { %482 = vst [vmem:[#allocation9 + $0x58] sm:$0xff] %v450_v62  ;;  %498 = vst [vmem:[#allocation9 + $0xd8] sm:$0xff] %v466_v63 }
 0x160   :  { %v340_v4 = vpop.f32.mrf.mxu0  ;;  %v420_v5 = vpop.f32.mrf.mxu1 }
 0x161   :  { %v451_v6 = vadd.f32 %v340_v4, %v98_v2  ;;  %v467_v7 = vadd.f32 %v420_v5, %v114_v3 }
 0x162   :  { %v342_v8 = vpop.f32.mrf.mxu0  ;;  %v422_v9 = vpop.f32.mrf.mxu1 }
 0x163   :  { %483 = vst [vmem:[#allocation9 + $0x60] sm:$0xff] %v451_v6  ;;  %499 = vst [vmem:[#allocation9 + $0xe0] sm:$0xff] %v467_v7 }
 0x164   :  { %v345_v12 = vpop.f32.mrf.mxu0  ;;  %v425_v13 = vpop.f32.mrf.mxu1 }
 0x165   :  { %v452_v14 = vadd.f32 %v345_v12, %v99_v10  ;;  %v468_v15 = vadd.f32 %v425_v13, %v115_v11 }
 0x166   :  { %v347_v16 = vpop.f32.mrf.mxu0  ;;  %v427_v17 = vpop.f32.mrf.mxu1 }
 0x167   :  { %484 = vst [vmem:[#allocation9 + $0x68] sm:$0xff] %v452_v14  ;;  %500 = vst [vmem:[#allocation9 + $0xe8] sm:$0xff] %v468_v15 }
 0x168   :  { %v350_v20 = vpop.f32.mrf.mxu0  ;;  %v430_v21 = vpop.f32.mrf.mxu1 }
 0x169   :  { %v453_v22 = vadd.f32 %v350_v20, %v100_v18  ;;  %v469_v23 = vadd.f32 %v430_v21, %v116_v19 }
 0x16a   :  { %v352_v24 = vpop.f32.mrf.mxu0  ;;  %v432_v25 = vpop.f32.mrf.mxu1 }
 0x16b   :  { %485 = vst [vmem:[#allocation9 + $0x70] sm:$0xff] %v453_v22  ;;  %501 = vst [vmem:[#allocation9 + $0xf0] sm:$0xff] %v469_v23 }
 0x16c   :  { %v355_v28 = vpop.f32.mrf.mxu0  ;;  %v435_v29 = vpop.f32.mrf.mxu1 }
 0x16d   :  { %v454_v30 = vadd.f32 %v355_v28, %v101_v26  ;;  %v470_v31 = vadd.f32 %v435_v29, %v117_v27 }
 0x16e   :  { %v357_v32 = vpop.f32.mrf.mxu0  ;;  %v437_v33 = vpop.f32.mrf.mxu1 }
 0x16f   :  { %486 = vst [vmem:[#allocation9 + $0x78] sm:$0xff] %v454_v30  ;;  %502 = vst [vmem:[#allocation9 + $0xf8] sm:$0xff] %v470_v31 }
 0x170 PF:  { %s669_s0 = smov [#allocation9]  }
 0x171   :  { %s508_s26 = sshll.u32 %s669_s0, 4  ;;  %s509_s26 = int_to_ptr.vmem [resolvable:$true] %s508_s26 }
 0x172   :  { %s635_s27 = scalar_lea.vmem %s509_s26, 4096  ;;  %p640_p12 = scmp.lt.s32.totalorder %s509_s26, %s509_s26 }
 0x173   :  { %p636_p11 = scmp.ne.s32.totalorder %s509_s26, %s635_s27  ;;  %p641_p13 = scmp.lt.s32.totalorder %s635_s27, %s635_s27 }
 0x175   :  { %p642_p0 = por %p641_p13, %p640_p12 }
 0x177   :  { %p643_p1 = pnand %p642_p0, %p636_p11 }
 0x179   :  { %646 = shalt.err (!%p643_p1)
}
 0x17a   :  { %514 = dma.vmem_to_hbm [thread:$0]  %s509_s26, 4096, %s775_s3, [#allocation6], %s665_s22, %s665_s22, %s666_s23  }
 0x17b   :  { %659 = dma.done.wait [#allocation6], 4096  }
 0x17c   :  { %660 = vsyncadd [#allocation6], 4294963200 }
 0x17d   :  { %518 = vsyncpa [#allocation5], 1 }
 0x17e   :  { %519 = vsyncpa [#allocation8], 1 }
 0x17f   :  { %520 = vsyncpa [#allocation6], 1 }

</bundles_post_ra>
